<compile_context>
chip_gen: v5e
topology: v5e:2x2
jax: 0.10.0
libtpu: 0.0.40
codegen_flags: <defaults>
</compile_context>

<pallas_src>
import math

import jax
import jax.numpy as jnp
from jax.experimental import pallas as pl
from jax.experimental.pallas import tpu as pltpu

_LANE = 128
_SUBLANE = 8
# ~256 KiB f32 input block (512 x 128); with double-buffered in+out blocks this
# is ~1 MiB of VMEM -> safe on v5e/v6e/v7x scoped-VMEM defaults.
_MAX_BLOCK_ROWS = 512
_MAX_BLOCK_LANES = 512


def _pick_block(extent, max_block, quantum):
    """Largest block <= max_block that divides `extent` and is a multiple of
    `quantum`; falls back to the full extent (a full dim is always legal)."""
    if extent <= max_block:
        return extent
    b = max_block - (max_block % quantum)
    while b >= quantum:
        if extent % b == 0:
            return b
        b -= quantum
    return extent


# ---------------------------------------------------------------------------
# torch-tensor-method -> jnp dispatch tables (pure jnp: safe for eval_shape
# and for tracing inside the kernel body).
# ---------------------------------------------------------------------------
_ELEMENTWISE = {
    "clamp":   lambda x, *a, **kw: jnp.clip(x, *a, **kw),
    "clip":    lambda x, *a, **kw: jnp.clip(x, *a, **kw),
    "relu":    lambda x: jnp.maximum(x, jnp.zeros((), x.dtype)),
    "sigmoid": lambda x: jax.nn.sigmoid(x),
    "tanh":    jnp.tanh,
    "abs":     jnp.abs,
    "exp":     jnp.exp,
    "neg":     jnp.negative,
    "add":     lambda x, other: x + other,
    "sub":     lambda x, other: x - other,
    "mul":     lambda x, other: x * other,
    "div":     lambda x, other: x / other,
    "pow":     lambda x, e: x ** e,
}


def _translate_reduce(fn):
    def wrapped(x, *a, **kw):
        kw = dict(kw)
        if "dim" in kw:
            kw["axis"] = kw.pop("dim")
        if "keepdim" in kw:
            kw["keepdims"] = kw.pop("keepdim")
        return fn(x, *a, **kw)
    return wrapped


_GENERIC = {  # shape-changing methods: fallback single-block path
    "sum":  _translate_reduce(jnp.sum),
    "mean": _translate_reduce(jnp.mean),
    "amax": _translate_reduce(jnp.max),
    "amin": _translate_reduce(jnp.min),
}


# ---------------------------------------------------------------------------
# Kernel builders (each returns a python fn x -> y, to be wrapped in jax.jit).
# ---------------------------------------------------------------------------
def _build_elementwise(kfn, shape, dtype):
    """Pointwise, shape-preserving method: flatten to a lane-dense (R, 128)
    slab and tile rows over a parallel grid."""
    out_sds = jax.eval_shape(kfn, jax.ShapeDtypeStruct(shape, dtype))
    n = math.prod(shape) if shape else 1
    if n == 0 or n % _LANE != 0:
        # Not lane-packable: single-block fallback.
        return _build_fallback(kfn, shape, dtype)

    rows = n // _LANE
    block_rows = _pick_block(rows, _MAX_BLOCK_ROWS, _SUBLANE)
    grid = (rows // block_rows,)

    def kernel(x_ref, o_ref):
        o_ref[...] = kfn(x_ref[...]).astype(o_ref.dtype)

    bytes_acc = n * (jnp.dtype(dtype).itemsize + jnp.dtype(out_sds.dtype).itemsize)
    call = pl.pallas_call(
        kernel,
        out_shape=jax.ShapeDtypeStruct((rows, _LANE), out_sds.dtype),
        grid=grid,
        in_specs=[pl.BlockSpec((block_rows, _LANE), lambda i: (i, 0))],
        out_specs=pl.BlockSpec((block_rows, _LANE), lambda i: (i, 0)),
        compiler_params=pltpu.CompilerParams(dimension_semantics=("parallel",)),
        cost_estimate=pl.CostEstimate(
            flops=2 * n, transcendentals=0, bytes_accessed=bytes_acc),
    )

    def fwd(x):
        return call(x.reshape(rows, _LANE)).reshape(out_sds.shape)

    return fwd


def _build_lastdim_softmax(shape, dtype, axis, log=False):
    """softmax / log_softmax along `axis` (shape preserving, row-wise reduce)."""
    ndim = len(shape)
    axis = axis % ndim
    D = shape[axis]
    n = math.prod(shape)
    R = n // D
    perm_shape = tuple(s for i, s in enumerate(shape) if i != axis) + (D,)

    # Pure-jnp reference for shape/dtype inference (no pl.* here on purpose).
    ref_full = (jax.nn.log_softmax if log else jax.nn.softmax)
    out_sds = jax.eval_shape(lambda v: ref_full(v, axis=axis),
                             jax.ShapeDtypeStruct(shape, dtype))

    def kfn(x2d, red_axis):
        xf = x2d.astype(jnp.float32)
        m = jnp.max(xf, axis=red_axis, keepdims=True)
        e = jnp.exp(xf - m)
        s = jnp.sum(e, axis=red_axis, keepdims=True)
        if log:
            return ((xf - m) - jnp.log(s)).astype(x2d.dtype)
        # approx=True -> EUP vrcp slot (otherwise idle); ~1e-4 relative error.
        return (e * pl.reciprocal(s, approx=True)).astype(x2d.dtype)

    cost = pl.CostEstimate(
        flops=5 * n, transcendentals=n + R,
        bytes_accessed=2 * n * jnp.dtype(dtype).itemsize)
    params = pltpu.CompilerParams(dimension_semantics=("parallel",))

    if D % _LANE == 0:
        # Reduce axis already lane-dense: keep (R, D), tile the row axis.
        max_rows = max(_SUBLANE, (_MAX_BLOCK_ROWS * _LANE) // D)
        max_rows -= max_rows % _SUBLANE
        block_rows = _pick_block(R, max(max_rows, _SUBLANE), _SUBLANE)

        def kernel(x_ref, o_ref):
            o_ref[...] = kfn(x_ref[...], -1)

        call = pl.pallas_call(
            kernel,
            out_shape=jax.ShapeDtypeStruct((R, D), out_sds.dtype),
            grid=(R // block_rows,),
            in_specs=[pl.BlockSpec((block_rows, D), lambda i: (i, 0))],
            out_specs=pl.BlockSpec((block_rows, D), lambda i: (i, 0)),
            compiler_params=params, cost_estimate=cost)

        def fwd(x):
            x2 = jnp.moveaxis(x, axis, -1).reshape(R, D)
            y2 = call(x2)
            return jnp.moveaxis(y2.reshape(perm_shape), -1, axis)

        return fwd

    if R % _LANE == 0:
        # Short reduce axis (e.g. W=16): present transposed so the R
        # independent rows sit on lanes (unmasked full-width stores) and the
        # reduce axis on sublanes; reduce along axis=0.
        block_lanes = _pick_block(R, _MAX_BLOCK_LANES, _LANE)

        def kernel(x_ref, o_ref):
            o_ref[...] = kfn(x_ref[...], 0)

        call = pl.pallas_call(
            kernel,
            out_shape=jax.ShapeDtypeStruct((D, R), out_sds.dtype),
            grid=(R // block_lanes,),
            in_specs=[pl.BlockSpec((D, block_lanes), lambda i: (0, i))],
            out_specs=pl.BlockSpec((D, block_lanes), lambda i: (0, i)),
            compiler_params=params, cost_estimate=cost)

        def fwd(x):
            x2 = jnp.moveaxis(x, axis, -1).reshape(R, D).T
            y2 = call(x2)
            return jnp.moveaxis(y2.T.reshape(perm_shape), -1, axis)

        return fwd

    # Neither axis packs cleanly onto lanes: single full-array block.
    def kernel(x_ref, o_ref):
        o_ref[...] = kfn(x_ref[...], axis)

    return pl.pallas_call(
        kernel,
        out_shape=jax.ShapeDtypeStruct(out_sds.shape, out_sds.dtype),
        in_specs=[pl.BlockSpec(memory_space=pltpu.MemorySpace.VMEM)],
        out_specs=pl.BlockSpec(memory_space=pltpu.MemorySpace.VMEM),
        cost_estimate=cost)


def _build_fallback(kfn, shape, dtype):
    """Generic (possibly shape-changing) method: single full-array VMEM block.
    Only intended for small test-sized tensors."""
    # TODO(synk): tile arbitrary / shape-changing tensor methods as well.
    out_sds = jax.eval_shape(kfn, jax.ShapeDtypeStruct(shape, dtype))

    def kernel(x_ref, o_ref):
        o_ref[...] = kfn(x_ref[...]).astype(o_ref.dtype)

    return pl.pallas_call(
        kernel,
        out_shape=jax.ShapeDtypeStruct(out_sds.shape, out_sds.dtype),
        in_specs=[pl.BlockSpec(memory_space=pltpu.MemorySpace.VMEM)],
        out_specs=pl.BlockSpec(memory_space=pltpu.MemorySpace.VMEM))


# ---------------------------------------------------------------------------
# The module
# ---------------------------------------------------------------------------
class PallasMethodModule:
    """Pallas-backed equivalent of the PyTorch MethodModule test helper.

    __call__(x) == getattr(x, self.method)(*self.args, **self.kwargs)
    """

    def __init__(self, method, *args, **kwargs):
        self.method = method
        self.args = args
        self.kwargs = kwargs
        self._cache = {}  # (shape, dtype) -> jitted specialized callable

    def __call__(self, x):
        key = (tuple(x.shape), jnp.dtype(x.dtype).name)
        fn = self._cache.get(key)
        if fn is None:
            fn = jax.jit(self._build(tuple(x.shape), x.dtype))
            self._cache[key] = fn
        return fn(x)

    def _build(self, shape, dtype):
        name, args, kwargs = self.method, self.args, self.kwargs
        if name in ("softmax", "log_softmax"):
            axis = kwargs.get("dim", args[0] if args else -1)
            return _build_lastdim_softmax(shape, dtype, axis,
                                          log=(name == "log_softmax"))
        if name in _ELEMENTWISE:
            ew = _ELEMENTWISE[name]
            kfn = lambda v: ew(v, *args, **kwargs)  # noqa: E731
            return _build_elementwise(kfn, shape, dtype)
        if name in _GENERIC:
            gfn = _GENERIC[name]
            kfn = lambda v: gfn(v, *args, **kwargs)  # noqa: E731
            return _build_fallback(kfn, shape, dtype)
        raise NotImplementedError(
            f"MethodModule method {name!r} has no Pallas mapping here")


if __name__ == "__main__":
    key = jax.random.PRNGKey(0)
    # NCHW activation tensor typical of the FX converter tests.
    x = jax.random.normal(key, (2, 4, 16, 16), dtype=jnp.float32)

    # Representative MethodModule instantiations (method, *args, **kwargs):
    #   MethodModule("softmax", dim=-1)  -> x.softmax(dim=-1)
    #   MethodModule("clamp", 0.0, 1.0)  -> x.clamp(0.0, 1.0)
    #   MethodModule("sigmoid")          -> x.sigmoid()
    softmax_mod = PallasMethodModule("softmax", dim=-1)
    clamp_mod = PallasMethodModule("clamp", 0.0, 1.0)
    sigmoid_mod = PallasMethodModule("sigmoid")

    y_softmax = jax.block_until_ready(softmax_mod(x))
    y_softmax2 = jax.block_until_ready(softmax_mod(x))  # hits the cached lowering
    y_clamp = jax.block_until_ready(clamp_mod(x))
    y_sigmoid = jax.block_until_ready(sigmoid_mod(x))

    ref_softmax = jax.nn.softmax(x, axis=-1)
    ref_clamp = jnp.clip(x, 0.0, 1.0)
    ref_sigmoid = jax.nn.sigmoid(x)

    assert y_softmax.shape == ref_softmax.shape and y_softmax.dtype == ref_softmax.dtype
    assert y_clamp.shape == ref_clamp.shape and y_clamp.dtype == ref_clamp.dtype
    assert y_sigmoid.shape == ref_sigmoid.shape and y_sigmoid.dtype == ref_sigmoid.dtype
    # approx reciprocal (EUP vrcp) is lower precision than exact -> relaxed tol.
    assert jnp.allclose(y_softmax, ref_softmax, atol=2e-3, rtol=2e-3)
    assert jnp.allclose(y_softmax2, y_softmax, atol=0.0, rtol=0.0)
    assert jnp.allclose(y_clamp, ref_clamp, atol=0.0, rtol=0.0)
    assert jnp.allclose(y_sigmoid, ref_sigmoid, atol=1e-5, rtol=1e-5)

    print("KERNEL_OK")
</pallas_src>

<mosaic_0001>
module attributes {stable_mosaic.version = 11 : i64} {
  func.func @kernel(%arg0: i32, %arg1: memref<16x128xf32, #tpu.memory_space<vmem>>, %arg2: memref<16x128xf32, #tpu.memory_space<vmem>>) attributes {dimension_semantics = [#tpu.dimension_semantics<parallel>], iteration_bounds = array<i64: 1>, scalar_prefetch = 0 : i64, scratch_operands = 0 : i64, tpu.core_type = #tpu.core_type<tc>, window_params = [{transform_indices = @transform_0, window_bounds = array<i64: 16, 128>}, {transform_indices = @transform_1, window_bounds = array<i64: 16, 128>}]} {
    %c0 = arith.constant 0 : index
    %c0_0 = arith.constant 0 : index
    %0 = vector.load %arg1[%c0, %c0_0] : memref<16x128xf32, #tpu.memory_space<vmem>>, vector<16x128xf32>
    %cst = arith.constant dense<0xFF800000> : vector<128xf32>
    %1 = vector.multi_reduction <maximumf>, %0, %cst [0] : vector<16x128xf32> to vector<128xf32>
    %2 = vector.shape_cast %1 : vector<128xf32> to vector<1x128xf32>
    %3 = vector.broadcast %2 : vector<1x128xf32> to vector<16x128xf32>
    %4 = arith.subf %0, %3 : vector<16x128xf32>
    %5 = math.exp %4 : vector<16x128xf32>
    %cst_1 = arith.constant dense<0.000000e+00> : vector<128xf32>
    %6 = vector.multi_reduction <add>, %5, %cst_1 [0] : vector<16x128xf32> to vector<128xf32>
    %7 = vector.shape_cast %6 : vector<128xf32> to vector<1x128xf32>
    %8 = tpu.reciprocal %7 {approx = true} : vector<1x128xf32> -> vector<1x128xf32>
    %9 = vector.broadcast %8 : vector<1x128xf32> to vector<16x128xf32>
    %10 = arith.mulf %5, %9 : vector<16x128xf32>
    %c0_2 = arith.constant 0 : index
    %c0_3 = arith.constant 0 : index
    %11 = vector.load %arg2[%c0_2, %c0_3] : memref<16x128xf32, #tpu.memory_space<vmem>>, vector<16x128xf32>
    tpu.vector_store %arg2[%c0_2, %c0_3], %10 {strides = array<i32>} : memref<16x128xf32, #tpu.memory_space<vmem>>, vector<16x128xf32>,
    return
  }
  func.func @transform_0(%arg0: i32) -> (i32, i32) {
    %c0_i32 = arith.constant 0 : i32
    %c0_i32_0 = arith.constant 0 : i32
    return %c0_i32, %arg0 : i32, i32
  }
  func.func @transform_1(%arg0: i32) -> (i32, i32) {
    %c0_i32 = arith.constant 0 : i32
    %c0_i32_0 = arith.constant 0 : i32
    return %c0_i32, %arg0 : i32, i32
  }
}

</mosaic_0001>

<bundles_post_ra>
// kernel: fwd.1
= control target key start
LH: loop header
LB: loop body
LE: loop exit
PB: predicated region body
PF: predicated region fallthrough
CT: control target
= control target key end

     0   :  { %s67_s0 = inlined_call_operand.vmem [shape: f32[16,128], index: 0, kind: input, shape index: {}]   ;;  %s68_s1 = inlined_call_operand.vmem [shape: f32[16,128], index: 1, kind: output, shape index: {}]  }
   0x1   :  { %v8_v0 = vld [vmem:[%s67_s0] sm:$0xff]  ;;  %v9_v1 = vld [vmem:[%s67_s0 + $0x8] sm:$0xff] }
   0x2   :  { %v10_v2 = vmax.f32 %v8_v0, %v9_v1 }
   0x4   :  { %v11_v3 = vrot.slane %v10_v2, 4 }
   0x6   :  { %v12_v4 = vmax.f32 %v10_v2, %v11_v3 }
   0x8   :  { %v13_v5 = vrot.slane %v12_v4, 2 }
   0xa   :  { %v14_v6 = vmax.f32 %v12_v4, %v13_v5 }
   0xc   :  { %v15_v7 = vrot.slane %v14_v6, 1 }
   0xe   :  { %v16_v8 = vmax.f32 %v14_v6, %v15_v7 }
  0x10   :  { %v17_v9 = vsub.f32 %v8_v0, %v16_v8  ;;  %v18_v10 = vsub.f32 %v9_v1, %v16_v8 }
  0x12   :  { %v19_v11 = vmul.f32 1.442695, %v17_v9  ;;  %v21_v12 = vmul.f32 1.442695, %v18_v10 }
  0x14   :  { %39 = vpow2.f32 %v19_v11 }
  0x15   :  { %41 = vpow2.f32 %v21_v12 }
  0x1a   :  { %v40_v13 = vpop.eup %39 }
  0x1b   :  { %v42_v14 = vpop.eup %41 }
  0x1c   :  { %v23_v15 = vadd.f32 %v42_v14, %v40_v13 }
  0x1e   :  { %v24_v16 = vrot.slane %v23_v15, 4 }
  0x20   :  { %v25_v17 = vadd.f32 %v24_v16, %v23_v15 }
  0x22   :  { %v26_v18 = vrot.slane %v25_v17, 2 }
  0x24   :  { %v27_v19 = vadd.f32 %v26_v18, %v25_v17 }
  0x26   :  { %v28_v20 = vrot.slane %v27_v19, 1 }
  0x28   :  { %v29_v21 = vadd.f32 %v28_v20, %v27_v19 }
  0x2a   :  { %43 = vrcp.f32 %v29_v21 }
  0x30   :  { %v44_v22 = vpop.eup %43 }
  0x31   :  { %v31_v23 = vmul.f32 %v44_v22, %v40_v13  ;;  %v32_v24 = vmul.f32 %v44_v22, %v42_v14 }
  0x33   :  { %33 = vst [vmem:[%s68_s1] sm:$0xff] %v31_v23 }
  0x34   :  { %34 = vst [vmem:[%s68_s1 + $0x8] sm:$0xff] %v32_v24 }

</bundles_post_ra>
